<compile_context>
chip_gen: v7x
topology: tpu7x:2x2x1
jax: 0.10.0
libtpu: 0.0.40
codegen_flags: <defaults>
</compile_context>

<pallas_src>
import functools

import jax
import jax.numpy as jnp
from jax import lax
from jax.experimental import pallas as pl
from jax.experimental.pallas import tpu as pltpu


def _round_up(x, m):
    return (x + m - 1) // m * m


def _proj_gelu_stats_kernel(x_ref, w_ref, b_ref, h_ref, stats_ref, *,
                            m_valid_last, need_mask, approx_gelu):
    # x_ref: (tm, Kp) bf16   w_ref: (Kp, Dp) bf16   b_ref: (1, Dp) f32
    # h_ref: (tm, Dp) bf16   stats_ref: (1, 2, Dp) f32  [row 0: sum, row 1: sum of squares]
    acc = jnp.dot(x_ref[...], w_ref[...], preferred_element_type=jnp.float32)
    acc = acc + b_ref[...]
    if approx_gelu:
        # tanh GELU (single EUP tanh). Slightly different numerics from PyTorch's
        # default exact nn.GELU(); off by default.
        c = jnp.float32(0.7978845608028654)  # sqrt(2/pi)
        h = 0.5 * acc * (1.0 + jnp.tanh(c * (acc + 0.044715 * acc * acc * acc)))
    else:
        # exact GELU (matches PyTorch nn.GELU() default, approximate='none')
        h = 0.5 * acc * (1.0 + lax.erf(acc * jnp.float32(0.7071067811865476)))
    h_ref[...] = h.astype(h_ref.dtype)

    def write_stats(hm):
        stats_ref[0, 0:1, :] = jnp.sum(hm, axis=0, keepdims=True)
        stats_ref[0, 1:2, :] = jnp.sum(hm * hm, axis=0, keepdims=True)

    if need_mask:
        # Only the last M tile contains padded rows (Mp - M < tm1); pay the
        # iota/compare/select cost only there.
        is_last = pl.program_id(0) == pl.num_programs(0) - 1

        @pl.when(is_last)
        def _():
            row = lax.broadcasted_iota(jnp.int32, h.shape, 0)
            write_stats(jnp.where(row < m_valid_last, h, 0.0))

        @pl.when(jnp.logical_not(is_last))
        def _():
            write_stats(h)
    else:
        write_stats(h)


def _bn_apply_kernel(h_ref, scale_ref, shift_ref, o_ref):
    # BN affine pre-folded: o = h * scale + shift (one mul + one add per element)
    o_ref[...] = (h_ref[...].astype(jnp.float32) * scale_ref[...]
                  + shift_ref[...]).astype(o_ref.dtype)


def patch_embedding(x, weight, bias, gamma, beta, patch_size, *,
                    block_m=256, block_m2=1024, approx_gelu=False):
    """x: (B, C, H, W) f32; weight: (dim, C, P, P); bias/gamma/beta: (dim,).

    Returns NCHW (B, dim, H//P, W//P), matching the PyTorch module with
    training-mode BatchNorm (biased batch statistics over N, H, W).
    """
    B, C, H, W = x.shape
    P = patch_size
    dim = weight.shape[0]
    Hp, Wp = H // P, W // P

    # im2col for a non-overlapping (stride == kernel) conv; flattening order
    # (C, Ph, Pw) matches the PyTorch conv weight layout (dim, C, Ph, Pw).
    # Cast to bf16 so the MXU runs at bf16 peak and the patch read is halved.
    patches = (
        x.reshape(B, C, Hp, P, Wp, P)
        .transpose(0, 2, 4, 1, 3, 5)
        .reshape(B * Hp * Wp, C * P * P)
        .astype(jnp.bfloat16)
    )
    w_mat = weight.reshape(dim, C * P * P).T.astype(jnp.bfloat16)   # (K, dim)

    M, K = patches.shape
    Kp = _round_up(K, 128)          # lane/MXU-width contraction
    Dp = _round_up(dim, 128)        # lane-dense output columns

    # pass-1 tile: forced multiple of 8 regardless of user block_m
    tm1 = max(8, min(_round_up(block_m, 8), _round_up(M, 8)))
    Mp = _round_up(M, tm1)
    gm1 = Mp // tm1

    # pass-2 tile: a multiple of tm1 that divides Mp (pure streaming -> bigger blocks)
    cap = max(1, block_m2 // tm1)
    g2 = 1
    for cand in range(min(gm1, cap), 0, -1):
        if gm1 % cand == 0:
            g2 = cand
            break
    tm2 = g2 * tm1
    gm2 = gm1 // g2

    patches_p = jnp.pad(patches, ((0, Mp - M), (0, Kp - K)))
    w_p = jnp.pad(w_mat, ((0, Kp - K), (0, Dp - dim)))
    b_p = jnp.pad(bias.astype(jnp.float32), (0, Dp - dim)).reshape(1, Dp)
    g_p = jnp.pad(gamma.astype(jnp.float32), (0, Dp - dim))
    beta_p = jnp.pad(beta.astype(jnp.float32), (0, Dp - dim))

    # Explicit VMEM budget: double-buffered streams + single-buffered weight, 2x headroom.
    p1_bytes = (2 * tm1 * Kp * 2      # x tile (bf16, double buffered)
                + Kp * Dp * 2         # weight (bf16, single buffered)
                + 2 * Dp * 4          # bias
                + 2 * tm1 * Dp * 2    # h out (bf16, double buffered)
                + 2 * 2 * Dp * 4)     # stats out
    p2_bytes = 2 * tm2 * Dp * 2 + 4 * Dp * 4 + 2 * tm2 * Dp * 4
    vmem_limit = int(min(max(2 * max(p1_bytes, p2_bytes), 32 * 1024 * 1024),
                         100 * 1024 * 1024))
    cparams = pltpu.CompilerParams(dimension_semantics=("parallel",),
                                   vmem_limit_bytes=vmem_limit)

    kern1 = functools.partial(
        _proj_gelu_stats_kernel,
        m_valid_last=M - (gm1 - 1) * tm1,
        need_mask=(Mp != M),
        approx_gelu=approx_gelu)

    # Pass 1: projection + GELU + per-tile partial BN sums (fully parallel M grid).
    h, stats = pl.pallas_call(
        kern1,
        out_shape=(jax.ShapeDtypeStruct((Mp, Dp), jnp.bfloat16),
                   jax.ShapeDtypeStruct((gm1, 2, Dp), jnp.float32)),
        grid=(gm1,),
        in_specs=[
            pl.BlockSpec((tm1, Kp), lambda i: (i, 0)),
            pl.BlockSpec((Kp, Dp), lambda i: (0, 0),
                         pipeline_mode=pl.Buffered(1)),   # resident weight, no double buffer
            pl.BlockSpec((1, Dp), lambda i: (0, 0),
                         pipeline_mode=pl.Buffered(1)),
        ],
        out_specs=(
            pl.BlockSpec((tm1, Dp), lambda i: (i, 0)),
            pl.BlockSpec((1, 2, Dp), lambda i: (i, 0, 0)),
        ),
        compiler_params=cparams,
    )(patches_p, w_p, b_p)

    # Finalize BN statistics (tiny (gm1, 2, Dp) reduction + folded affine in XLA).
    sums = jnp.sum(stats, axis=0)                        # (2, Dp)
    mean = sums[0] / jnp.float32(M)
    var = sums[1] / jnp.float32(M) - mean * mean         # biased (training-mode) variance
    inv = lax.rsqrt(var + jnp.float32(1e-5))
    scale = (g_p * inv).reshape(1, Dp)
    shift = (beta_p - mean * (g_p * inv)).reshape(1, Dp)

    # Pass 2: apply normalization with its own, larger streaming tile.
    out = pl.pallas_call(
        _bn_apply_kernel,
        out_shape=jax.ShapeDtypeStruct((Mp, Dp), jnp.float32),
        grid=(gm2,),
        in_specs=[
            pl.BlockSpec((tm2, Dp), lambda i: (i, 0)),
            pl.BlockSpec((1, Dp), lambda i: (0, 0)),
            pl.BlockSpec((1, Dp), lambda i: (0, 0)),
        ],
        out_specs=pl.BlockSpec((tm2, Dp), lambda i: (i, 0)),
        compiler_params=cparams,
    )(h, scale, shift)

    # Drop K/D/M padding and return NCHW to match the PyTorch module.
    # TODO(synk): the NCHW transpose is one extra XLA read+write of the full output;
    #             return the channel-last (B, Hp, Wp, dim) slab directly if the consumer allows.
    return out[:M, :dim].reshape(B, Hp, Wp, dim).transpose(0, 3, 1, 2)


def _reference(x, weight, bias, gamma, beta, patch_size):
    # independent pure-JAX reference (conv + exact gelu + training-mode batchnorm), all f32
    y = lax.conv_general_dilated(
        x, weight, window_strides=(patch_size, patch_size), padding="VALID",
        dimension_numbers=("NCHW", "OIHW", "NCHW"),
    ) + bias.reshape(1, -1, 1, 1)
    y = jax.nn.gelu(y, approximate=False)
    mean = jnp.mean(y, axis=(0, 2, 3), keepdims=True)
    var = jnp.mean((y - mean) ** 2, axis=(0, 2, 3), keepdims=True)
    y = (y - mean) * lax.rsqrt(var + 1e-5)
    return gamma.reshape(1, -1, 1, 1) * y + beta.reshape(1, -1, 1, 1)


if __name__ == "__main__":
    B, C, H, W = 2, 4, 16, 16
    P = 4
    dim = 32

    key = jax.random.PRNGKey(0)
    kx, kw, kb, kg, kbeta = jax.random.split(key, 5)
    x = jax.random.normal(kx, (B, C, H, W), dtype=jnp.float32)
    # deterministic parameter init (synthetic; not a checkpoint load)
    weight = jax.random.normal(kw, (dim, C, P, P), dtype=jnp.float32) * 0.1
    bias = jax.random.normal(kb, (dim,), dtype=jnp.float32) * 0.1
    gamma = 1.0 + 0.1 * jax.random.normal(kg, (dim,), dtype=jnp.float32)
    beta = 0.1 * jax.random.normal(kbeta, (dim,), dtype=jnp.float32)

    # block_m=8 / block_m2=16 so the toy problem (M=32) exercises real multi-block
    # grids in both passes (4 tiles in pass 1, 2 tiles in pass 2).
    out = patch_embedding(x, weight, bias, gamma, beta, P, block_m=8, block_m2=16)
    out = jax.block_until_ready(out)

    ref = jax.block_until_ready(_reference(x, weight, bias, gamma, beta, P))
    assert out.shape == (B, dim, H // P, W // P), out.shape
    # bf16 MXU operands + bf16 intermediate h -> deliberately relaxed tolerance
    # vs the all-f32 exact-GELU reference.
    max_err = float(jnp.max(jnp.abs(out - ref)))
    assert jnp.allclose(out, ref, atol=7.5e-2, rtol=5e-2), max_err

    print("KERNEL_OK")
</pallas_src>

<mosaic_0001>
module attributes {stable_mosaic.version = 11 : i64} {
  func.func @_proj_gelu_stats_kernel(%arg0: i32, %arg1: memref<8x128xbf16, #tpu.memory_space<vmem>>, %arg2: memref<128x128xbf16, #tpu.memory_space<vmem>>, %arg3: memref<1x128xf32, #tpu.memory_space<vmem>>, %arg4: memref<8x128xbf16, #tpu.memory_space<vmem>>, %arg5: memref<1x2x128xf32, #tpu.memory_space<vmem>>) attributes {dimension_semantics = [#tpu.dimension_semantics<parallel>], iteration_bounds = array<i64: 4>, scalar_prefetch = 0 : i64, scratch_operands = 0 : i64, tpu.core_type = #tpu.core_type<tc>, window_params = [{transform_indices = @transform_0, window_bounds = array<i64: 8, 128>}, {pipeline_mode = #tpu.pipeline_mode<synchronous>, transform_indices = @transform_1, window_bounds = array<i64: 128, 128>}, {pipeline_mode = #tpu.pipeline_mode<synchronous>, transform_indices = @transform_2, window_bounds = array<i64: 1, 128>}, {transform_indices = @transform_3, window_bounds = array<i64: 8, 128>}, {transform_indices = @transform_4, window_bounds = array<i64: 1, 2, 128>}]} {
    %c0 = arith.constant 0 : index
    %c0_0 = arith.constant 0 : index
    %0 = vector.load %arg1[%c0, %c0_0] : memref<8x128xbf16, #tpu.memory_space<vmem>>, vector<8x128xbf16>
    %c0_1 = arith.constant 0 : index
    %c0_2 = arith.constant 0 : index
    %1 = vector.load %arg2[%c0_1, %c0_2] : memref<128x128xbf16, #tpu.memory_space<vmem>>, vector<128x128xbf16>
    %cst = arith.constant dense<0.000000e+00> : vector<8x128xf32>
    %2 = tpu.matmul %0, %1, %cst {dimension_numbers = #tpu.dot_dimension_numbers<[1], [0], [0], [1], [0, 0, 1, 1], [], []>} : vector<8x128xbf16>, vector<128x128xbf16>, vector<8x128xf32> -> vector<8x128xf32>
    %c0_3 = arith.constant 0 : index
    %c0_4 = arith.constant 0 : index
    %3 = vector.load %arg3[%c0_3, %c0_4] : memref<1x128xf32, #tpu.memory_space<vmem>>, vector<1x128xf32>
    %4 = vector.broadcast %3 : vector<1x128xf32> to vector<8x128xf32>
    %5 = arith.addf %2, %4 : vector<8x128xf32>
    %cst_5 = arith.constant 5.000000e-01 : f32
    %6 = vector.broadcast %cst_5 : f32 to vector<8x128xf32>
    %7 = arith.mulf %6, %5 : vector<8x128xf32>
    %cst_6 = arith.constant 0.707106769 : f32
    %8 = vector.broadcast %cst_6 : f32 to vector<8x128xf32>
    %9 = arith.mulf %5, %8 : vector<8x128xf32>
    %10 = math.erf %9 : vector<8x128xf32>
    %cst_7 = arith.constant 1.000000e+00 : f32
    %11 = vector.broadcast %cst_7 : f32 to vector<8x128xf32>
    %12 = arith.addf %11, %10 : vector<8x128xf32>
    %13 = arith.mulf %7, %12 : vector<8x128xf32>
    %14 = arith.truncf %13 : vector<8x128xf32> to vector<8x128xbf16>
    %c0_8 = arith.constant 0 : index
    %c0_9 = arith.constant 0 : index
    %15 = vector.load %arg4[%c0_8, %c0_9] : memref<8x128xbf16, #tpu.memory_space<vmem>>, vector<8x128xbf16>
    tpu.vector_store %arg4[%c0_8, %c0_9], %14 {strides = array<i32>} : memref<8x128xbf16, #tpu.memory_space<vmem>>, vector<8x128xbf16>,
    %cst_10 = arith.constant dense<0.000000e+00> : vector<128xf32>
    %16 = vector.multi_reduction <add>, %13, %cst_10 [0] : vector<8x128xf32> to vector<128xf32>
    %17 = vector.shape_cast %16 : vector<128xf32> to vector<1x128xf32>
    %c0_11 = arith.constant 0 : index
    %c0_12 = arith.constant 0 : index
    %c0_13 = arith.constant 0 : index
    %18 = vector.load %arg5[%c0_11, %c0_12, %c0_13] : memref<1x2x128xf32, #tpu.memory_space<vmem>>, vector<1x1x128xf32>
    %19 = vector.shape_cast %18 : vector<1x1x128xf32> to vector<1x128xf32>
    %20 = vector.shape_cast %17 : vector<1x128xf32> to vector<1x1x128xf32>
    tpu.vector_store %arg5[%c0_11, %c0_12, %c0_13], %20 {strides = array<i32>} : memref<1x2x128xf32, #tpu.memory_space<vmem>>, vector<1x1x128xf32>,
    %21 = arith.mulf %13, %13 : vector<8x128xf32>
    %cst_14 = arith.constant dense<0.000000e+00> : vector<128xf32>
    %22 = vector.multi_reduction <add>, %21, %cst_14 [0] : vector<8x128xf32> to vector<128xf32>
    %23 = vector.shape_cast %22 : vector<128xf32> to vector<1x128xf32>
    %c0_15 = arith.constant 0 : index
    %c1 = arith.constant 1 : index
    %c0_16 = arith.constant 0 : index
    %24 = vector.load %arg5[%c0_15, %c1, %c0_16] : memref<1x2x128xf32, #tpu.memory_space<vmem>>, vector<1x1x128xf32>
    %25 = vector.shape_cast %24 : vector<1x1x128xf32> to vector<1x128xf32>
    %26 = vector.shape_cast %23 : vector<1x128xf32> to vector<1x1x128xf32>
    tpu.vector_store %arg5[%c0_15, %c1, %c0_16], %26 {strides = array<i32>} : memref<1x2x128xf32, #tpu.memory_space<vmem>>, vector<1x1x128xf32>,
    return
  }
  func.func @transform_0(%arg0: i32) -> (i32, i32) {
    %c0_i32 = arith.constant 0 : i32
    %c0_i32_0 = arith.constant 0 : i32
    return %arg0, %c0_i32 : i32, i32
  }
  func.func @transform_1(%arg0: i32) -> (i32, i32) {
    %c0_i32 = arith.constant 0 : i32
    %c0_i32_0 = arith.constant 0 : i32
    %c0_i32_1 = arith.constant 0 : i32
    return %c0_i32, %c0_i32_0 : i32, i32
  }
  func.func @transform_2(%arg0: i32) -> (i32, i32) {
    %c0_i32 = arith.constant 0 : i32
    %c0_i32_0 = arith.constant 0 : i32
    %c0_i32_1 = arith.constant 0 : i32
    return %c0_i32, %c0_i32_0 : i32, i32
  }
  func.func @transform_3(%arg0: i32) -> (i32, i32) {
    %c0_i32 = arith.constant 0 : i32
    %c0_i32_0 = arith.constant 0 : i32
    return %arg0, %c0_i32 : i32, i32
  }
  func.func @transform_4(%arg0: i32) -> (i32, i32, i32) {
    %c0_i32 = arith.constant 0 : i32
    %c0_i32_0 = arith.constant 0 : i32
    %c0_i32_1 = arith.constant 0 : i32
    return %arg0, %c0_i32, %c0_i32_0 : i32, i32, i32
  }
}

</mosaic_0001>

<bundles_post_ra>
// kernel: tpu_custom_call.1
= control target key start
LH: loop header
LB: loop body
LE: loop exit
PB: predicated region body
PF: predicated region fallthrough
CT: control target
= control target key end

     0   :  { %10 = vsyncpa [#allocation3], 0  ;;  %s1074_s0 = inlined_call_operand.hbm [shape: bf16[32,128], index: 0, kind: input, shape index: {}]   ;;  %s1075_s1 = inlined_call_operand.hbm [shape: bf16[128,128], index: 1, kind: input, shape index: {}]   ;;  %s1076_s2 = inlined_call_operand.vmem [shape: f32[1,128], index: 2, kind: input, shape index: {}]   ;;  %s1077_s3 = inlined_call_operand.hbm [shape: bf16[32,128], index: 3, kind: output, shape index: {0}]   ;;  %s1078_s4 = inlined_call_operand.hbm [shape: f32[4,2,128], index: 4, kind: output, shape index: {1}]  }
   0x1   :  { %12 = vsyncpa [#allocation3 + $0x1], 0 }
   0x2   :  { %13 = vsyncpa [#allocation6], 0 }
   0x3   :  { %14 = vsyncpa [#allocation4], 0 }
   0x4   :  { %16 = vsyncpa [#allocation4 + $0x1], 0 }
   0x5   :  { %17 = vsyncpa [#allocation9], 0 }
   0x6   :  { %19 = vsyncpa [#allocation9 + $0x1], 0  ;;  %s844_s15 = smov 0   ;;  %s846_s16 = smov 0  }
   0x7   :  { %s848_s17 = smov 0   ;;  %s850_s18 = smov 0  }
   0x8 LB: > { %s865_s19 = sadd.s32 4294967295, %s809_s18   ;;  %s518_s20 = sadd.s32 4294967294, %s809_s18   ;;  %s809_s18 = sphi %s850_s18, %s1097_s18   ;;  %s805_s17 = sphi %s848_s17, %s1096_s17   ;;  %s801_s16 = sphi %s846_s16, %s1095_s16   ;;  %s797_s15 = sphi %s844_s15, %s1094_s15  }
   0x9   : > { %p45_p0 = scmp.ne.s32.totalorder %s801_s16, %s797_s15  ;;  %p1079_p1 = scmp.eq.s32.totalorder %s865_s19, 0 }
   0xa   : > { %p117_p3 = scmp.eq.s32.totalorder %s518_s20, 3  ;;  %p519_p5 = scmp.ge.s32.totalorder %s809_s18, 1 }
   0xb   : > { %p874_p4 = por %p1079_p1, %p45_p0  ;;  %p150_p7 = scmp.lt.s32.totalorder %s809_s18, 5 }
   0xc   : > { %p879_p6 = por %p117_p3, %p45_p0  ;;  %s811_s24 = smov [#allocation5]  }
   0xd   : > { %s1082_s21 = scalar_select %p874_p4, 1, 0 }
   0xe   : > { %s1083_s22 = scalar_select %p879_p6, 1, 0 }
   0xf   : > { %p884_p8 = pnand %p519_p5, %p150_p7  ;;  %s162_s25 = sshll.u32 %s811_s24, 4  ;;  %s163_s25 = int_to_ptr.vmem [resolvable:$true] %s162_s25 }
  0x10   : > { %s897_s27 = sadd.s32 1, %s809_s18   ;;  %s32_s28 = sadd.s32 1, %s805_s17 }
  0x11   : > { %s1084_s23 = scalar_select %p884_p8, 1, 0 }
  0x12   : > { %p583_p9 = pneg %p884_p8  ;;  %s29_s29 = ssub.s32 %s809_s18, %s897_s27 }
  0x13   : > { %s649_s6 = scalar_lea.hbm %s1075_s1, 1024 }
  0x14   : > { %p892_p10 = pnand %p583_p9, %p1079_p1  ;;  %p650_p11 = scmp.ne.s32.totalorder %s1075_s1, %s649_s6 }
  0x15   : > { %p656_p3 = scmp.lt.u32.totalorder %s649_s6, %s1075_s1 }
  0x16   : > { %p651_p12 = pneg %p892_p10 }
  0x18   : > { %p652_p13 = pnand %p651_p12, %p650_p11 }
  0x1a   : > { %p653_p0 = pneg %p652_p13 }
  0x1c   : > { %p658_p5 = pnand %p656_p3, %p653_p0 }
  0x1e   : > { %661 = shalt.err (!%p658_p5)
}
  0x1f   : > { %s662_s11 = scalar_lea.vmem %s163_s25, 1024  ;;  %p670_p2 = scmp.lt.s32.totalorder %s163_s25, %s163_s25 }
  0x20   : > { %p663_p7 = scmp.ne.s32.totalorder %s163_s25, %s662_s11  ;;  %p671_p6 = scmp.lt.s32.totalorder %s662_s11, %s662_s11 }
  0x22   : > { %p665_p9 = pnand %p663_p7, %p651_p12  ;;  %p672_p4 = por %p671_p6, %p670_p2 }
  0x24   : > { %p666_p1 = pneg %p665_p9 }
  0x26   : > { %p673_p8 = pnand %p672_p4, %p666_p1 }
  0x28   : > { %676 = shalt.err (!%p673_p8)
}
  0x29   : > { %s812_s12 = smov 64   ;;  %s813_s13 = smov 4  }
  0x2a   : > { %586 = dma.hbm_to_vmem [thread:$0]  (!%p892_p10), %s1075_s1, 1024, %s163_s25, [#allocation6], %s812_s12, %s812_s12, %s813_s13  }
  0x2b   : > { %p30_p11 = scmp.eq.s32.totalorder %s29_s29, 0  ;;  %p39_p2 = scmp.ne.s32.totalorder %s805_s17, %s801_s16 }
  0x2c   : > { %p40_p1 = scmp.eq.s32.totalorder %s809_s18, 0  ;;  %p599_p4 = scmp.lt.s32.totalorder %s809_s18, 4 }
  0x2d   : > { %s923_s24 = scalar_select %p30_p11, %s805_s17, %s32_s28  }
  0x2e   : > { %p41_p6 = por %p40_p1, %p39_p2  ;;  %p1086_p8 = scmp.eq.s32.totalorder %s865_s19, 3 }
  0x2f   : > { %s179_s5 = sand.u32 1, %s805_s17   ;;  %s523_s6 = sshll.u32 %s809_s18, 6 }
  0x30   : > { %p927_p12 = por %p1086_p8, %p39_p2  ;;  %s522_s7 = sshll.u32 %s179_s5, 2 }
  0x31   : > { %s936_s9 = scalar_lea.hbm %s1074_s0, %s523_s6  ;;  %s183_s25 = scalar_lea.vmem [#allocation2], %s522_s7 }
  0x32   : > { %s190_s28 = sshll.u32 %s183_s25, 4  ;;  %p938_p10 = pnand %p599_p4, %p41_p6  ;;  %s942_s28 = int_to_ptr.vmem [resolvable:$true] %s190_s28 }
  0x33   : > { %s180_s10 = scalar_lea.sflag [#allocation3], %s179_s5  ;;  %s677_s11 = scalar_lea.hbm %s936_s9, 64 }
  0x34   : > { %p678_p13 = scmp.ne.s32.totalorder %s936_s9, %s677_s11  ;;  %p679_p0 = pneg %p938_p10 }
  0x35   : > { %s682_s14 = scalar_lea.hbm %s1074_s0, 256  ;;  %p683_p7 = scmp.lt.u32.totalorder %s936_s9, %s1074_s0 }
  0x36   : > { %p680_p3 = pnand %p679_p0, %p678_p13  ;;  %p684_p9 = scmp.lt.u32.totalorder %s682_s14, %s677_s11 }
  0x37   : > { %p686_p2 = scmp.lt.u32.totalorder %s677_s11, %s936_s9 }
  0x38   : > { %p681_p5 = pneg %p680_p3  ;;  %p685_p11 = por %p684_p9, %p683_p7 }
  0x3a   : > { %p687_p1 = por %p686_p2, %p685_p11 }
  0x3c   : > { %p688_p4 = pnand %p687_p1, %p681_p5 }
  0x3e   : > { %691 = shalt.err (!%p688_p4)
}
  0x3f   : > { %s692_s5 = scalar_lea.vmem %s942_s28, 64  ;;  %s814_s7 = smov [#allocation2]  }
  0x40   : > { %p693_p6 = scmp.ne.s32.totalorder %s942_s28, %s692_s5  ;;  %s697_s26 = sshll.u32 %s814_s7, 4  ;;  %s698_s26 = int_to_ptr.vmem [resolvable:$false] %s697_s26 }
  0x41   : > { %s699_s8 = scalar_lea.vmem %s698_s26, 128  ;;  %p700_p3 = scmp.lt.s32.totalorder %s942_s28, %s698_s26 }
  0x42   : > { %p695_p8 = pnand %p693_p6, %p679_p0  ;;  %p701_p7 = scmp.lt.s32.totalorder %s699_s8, %s692_s5 }
  0x44   : > { %p696_p13 = pneg %p695_p8  ;;  %p702_p9 = por %p701_p7, %p700_p3 }
  0x46   : > { %p703_p11 = pnand %p702_p9, %p696_p13 }
  0x48   : > { %706 = shalt.err (!%p703_p11)
}
  0x49   : > { %590 = dma.hbm_to_vmem [thread:$0]  (!%p938_p10), %s936_s9, 64, %s942_s28, %s180_s10  }
  0x4a   : > { %p1089_p5 = scmp.ne.s32.totalorder %s1084_s23, 0 }
  0x4b   : > { %s972_s25 = sand.u32 (!%p1089_p5), 1, %s801_s16   ;;  %p1090_p0 = scmp.ne.s32.totalorder (!%p1089_p5), %s1082_s21, 0 }
  0x4c   : > { %199 = sbr.rel (%p1089_p5) target bundleno = 392 (0x188), region = 32  ;;  %s525_s11 = sshll.u32 (!%p1089_p5), %s972_s25, 2 }
  0x4d   : > { %s202_s12 = scalar_lea.sflag (!%p1089_p5), [#allocation3], %s972_s25  ;;  %s978_s13 = scalar_lea.vmem (!%p1089_p5), [#allocation2], %s525_s11 }
  0x53   : > { %780 = dma.done.wait (%p1090_p0), %s202_s12, 64  }
  0x54   : > { %782 = vsyncadd (%p1090_p0), %s202_s12, 4294967232  ;;  %p1091_p10 = scmp.eq.s32.totalorder %s865_s19, 0 }
  0x56   : > { %784 = dma.done.wait (%p1091_p10), [#allocation6], 1024   ;;  %p1092_p2 = pmov %p1091_p10 }
  0x57   : > { %v815_v0 = vmov 0.0   ;;  %vm816_vm0 = vmmov 0   ;;  %v639_v1 = vld [vmem:[#allocation5] sm:$0xff]   ;;  %v640_v2 = vld [vmem:[#allocation5 + $0x8] sm:$0xff]   ;;  %v641_v3 = vld [vmem:[#allocation5 + $0x10] sm:$0xff]   ;;  %s540_s9 = sshll.u32 %s865_s19, 6 }
  0x58   : > { %786 = vsyncadd (%p1092_p2), [#allocation6], 4294966272  ;;  %553 = vmatprep.subr.bf16.mxu0 %v815_v0  ;;  %569 = vmatprep.mubr.msk.bf16.mxu0 %vm816_vm0, %v815_v0  ;;  %v642_v4 = vld [vmem:[#allocation5 + $0x18] sm:$0xff]   ;;  %v643_v5 = vld [vmem:[#allocation5 + $0x20] sm:$0xff]   ;;  %s231_s28 = scalar_lea.vmem [#allocation7], %s525_s11  ;;  %s998_s20 = scalar_lea.hbm %s1077_s3, %s540_s9 }
  0x59   : > { %554 = vmatpush3.bf16.msra.mxu0 %v639_v1  ;;  %v644_v6 = vld [vmem:[#allocation5 + $0x28] sm:$0xff]   ;;  %v645_v7 = vld [vmem:[#allocation5 + $0x30] sm:$0xff]   ;;  %v646_v8 = vld [vmem:[#allocation5 + $0x38] sm:$0xff]   ;;  %s393_s29 = sshll.u32 %s231_s28, 4  ;;  %s528_s6 = sshll.u32 %s972_s25, 1  ;;  %s1000_s29 = int_to_ptr.vmem [resolvable:$true] %s393_s29 }
  0x5a   : > { %555 = vmatprep.subr.bf16.mxu0 %v815_v0  ;;  %v240_v9 = vld [vmem:[%s978_s13] sm:$0xf]  ;;  %s375_s5 = scalar_lea.sflag [#allocation4], %s972_s25  ;;  %s707_s7 = scalar_lea.vmem %s1000_s29, 64 }
  0x5b   : > { %v529_v10 = vld [vmem:[%s1076_s2] ss:$0 sm:$0xff]  ;;  %p708_p1 = scmp.ne.s32.totalorder %s1000_s29, %s707_s7  ;;  %s817_s26 = smov [#allocation7]  }
  0x5c   : > { %s711_s8 = sshll.u32 %s817_s26, 4  ;;  %s712_s8 = int_to_ptr.vmem [resolvable:$false] %s711_s8 }
  0x5d   : > { %556 = vmatpush3.bf16.msra.mxu0 %v640_v2  ;;  %p709_p4 = pnand %p708_p1, %p927_p12  ;;  %s713_s11 = scalar_lea.vmem %s712_s8, 128 }
  0x5e   : > { %557 = vmatprep.subr.bf16.mxu0 %v815_v0  ;;  %p714_p8 = scmp.lt.s32.totalorder %s1000_s29, %s712_s8  ;;  %p715_p13 = scmp.lt.s32.totalorder %s713_s11, %s707_s7 }
  0x5f   : > { %p710_p6 = pneg %p709_p4 }
  0x60   : > { %p716_p3 = por %p715_p13, %p714_p8 }
  0x61   : > { %558 = vmatpush3.bf16.msra.mxu0 %v641_v3 }
  0x62   : > { %559 = vmatprep.subr.bf16.mxu0 %v815_v0  ;;  %p717_p7 = pnand %p716_p3, %p710_p6 }
  0x65   : > { %560 = vmatpush3.bf16.msra.mxu0 %v642_v4 }
  0x66   : > { %561 = vmatprep.subr.bf16.mxu0 %v815_v0 }
  0x69   : > { %562 = vmatpush3.bf16.msra.mxu0 %v643_v5 }
  0x6a   : > { %563 = vmatprep.subr.bf16.mxu0 %v815_v0 }
  0x6d   : > { %564 = vmatpush3.bf16.msra.mxu0 %v644_v6 }
  0x6e   : > { %565 = vmatprep.subr.bf16.mxu0 %v815_v0 }
  0x71   : > { %566 = vmatpush3.bf16.msra.mxu0 %v645_v7 }
  0x72   : > { %567 = vmatprep.subr.bf16.mxu0 %v815_v0 }
  0x75   : > { %568 = vmatpush3.bf16.msra.mxu0 %v646_v8 }
  0x78   : > { %570 = vmatmul.mubr.bf16.vlgmr.msra.gmra.mrb[0].mxu0 %v240_v9 }
 0x14b   : > { %v346_v11 = vpop.f32.mrb[0].mxu0 }
 0x14c   : > { %v347_v12 = vadd.f32 %v529_v10, %v346_v11  ;;  %v571_v13 = vpop.f32.mrb[1].mxu0 }
 0x14d   : > { %v349_v14 = vpop.f32.mrb[2].mxu0 }
 0x14e   : > { %v353_v15 = vmul.f32 0.70710677, %v347_v12  ;;  %v572_v16 = vpop.f32.mrb[3].mxu0  ;;  %v352_v18 = vmul.f32 0.5, %v347_v12 }
 0x150   : > { %647 = verf.f32 %v353_v15 }
 0x15a   : > { %v648_v17 = vpop.eup %647 }
 0x15b   : > { %v355_v19 = vadd.f32 1.0, %v648_v17 }
 0x15d   : > { %v356_v20 = vmul.f32 %v355_v19, %v352_v18 }
 0x15f   : > { %v359_v21 = vrot.slane %v356_v20, 4  ;;  %v366_v22 = vmul.f32 %v356_v20, %v356_v20  ;;  %v357_v23 = vpack.c.bf16 %v356_v20, %v356_v20 }
 0x161   : > { %v360_v24 = vadd.f32 %v359_v21, %v356_v20  ;;  %v367_v25 = vrot.slane %v366_v22, 4  ;;  %358 = vst [vmem:[%s231_s28] sm:$0xf] %v357_v23 }
 0x162   : > { %720 = shalt.err (!%p717_p7)
}
 0x163   : > { %s721_s12 = scalar_lea.hbm %s998_s20, 64  ;;  %s725_s23 = scalar_lea.hbm %s1077_s3, 256 }
 0x164   : > { %p722_p9 = scmp.ne.s32.totalorder %s998_s20, %s721_s12  ;;  %p726_p0 = scmp.lt.u32.totalorder %s998_s20, %s1077_s3 }
 0x165   : > { %p727_p10 = scmp.lt.u32.totalorder %s725_s23, %s721_s12  ;;  %p729_p1 = scmp.lt.u32.totalorder %s721_s12, %s998_s20 }
 0x166   : > { %p723_p11 = pnand %p722_p9, %p927_p12 }
 0x167   : > { %p728_p2 = por %p727_p10, %p726_p0 }
 0x168   : > { %p724_p5 = pneg %p723_p11 }
 0x169   : > { %p730_p4 = por %p729_p1, %p728_p2 }
 0x16b   : > { %p731_p6 = pnand %p730_p4, %p724_p5 }
 0x16d   : > { %734 = shalt.err (!%p731_p6)
}
 0x16e   : > { %579 = dma.vmem_to_hbm [thread:$0]  (%p927_p12), %s1000_s29, 64, %s998_s20, %s375_s5   ;;  %v361_v26 = vrot.slane %v360_v24, 2  ;;  %v368_v27 = vadd.f32 %v367_v25, %v366_v22 }
 0x16f   : > { %s541_s10 = sshll.u32 %s865_s19, 5  ;;  %s238_s14 = scalar_lea.vmem [#allocation8], %s528_s6 }
 0x170   : > { %v362_v28 = vadd.f32 %v361_v26, %v360_v24  ;;  %v369_v29 = vrot.slane %v368_v27, 2  ;;  %s406_s7 = sshll.u32 %s238_s14, 4  ;;  %s1031_s29 = scalar_lea.hbm %s1078_s4, %s541_s10  ;;  %s1033_s7 = int_to_ptr.vmem [resolvable:$true] %s406_s7 }
 0x171   : > { %s380_s20 = scalar_lea.sflag [#allocation9], %s972_s25  ;;  %s735_s19 = scalar_lea.vmem %s1033_s7, 32 }
 0x172   : > { %v363_v30 = vrot.slane %v362_v28, 1  ;;  %v370_v31 = vadd.f32 %v369_v29, %v368_v27  ;;  %p736_p8 = scmp.ne.s32.totalorder %s1033_s7, %s735_s19  ;;  %s818_s6 = smov [#allocation8]  }
 0x173   : > { %s739_s5 = sshll.u32 %s818_s6, 4  ;;  %s740_s5 = int_to_ptr.vmem [resolvable:$false] %s739_s5 }
 0x174   : > { %v364_v32 = vadd.f32 %v363_v30, %v362_v28  ;;  %v371_v33 = vrot.slane %v370_v31, 1  ;;  %p737_p13 = pnand %p736_p8, %p927_p12  ;;  %s741_s11 = scalar_lea.vmem %s740_s5, 64 }
 0x175   : > { %p742_p7 = scmp.lt.s32.totalorder %s1033_s7, %s740_s5  ;;  %p743_p9 = scmp.lt.s32.totalorder %s741_s11, %s735_s19 }
 0x176   : > { %365 = vst [vmem:[%s238_s14] sm:$0x1] %v364_v32  ;;  %v372_v34 = vadd.f32 %v371_v33, %v370_v31  ;;  %p738_p3 = pneg %p737_p13 }
 0x177   : > { %p744_p11 = por %p743_p9, %p742_p7 }
 0x178   : > { %373 = vst [vmem:[%s238_s14 + $0x1] sm:$0x1] %v372_v34 }
 0x179   : > { %p745_p5 = pnand %p744_p11, %p738_p3 }
 0x17b   : > { %748 = shalt.err (!%p745_p5)
}
 0x17c   : > { %s749_s25 = scalar_lea.hbm %s1031_s29, 32  ;;  %s753_s21 = scalar_lea.hbm %s1078_s4, 128 }
 0x17d   : > { %p750_p0 = scmp.ne.s32.totalorder %s1031_s29, %s749_s25  ;;  %p754_p1 = scmp.lt.u32.totalorder %s1031_s29, %s1078_s4 }
 0x17e   : > { %p755_p4 = scmp.lt.u32.totalorder %s753_s21, %s749_s25  ;;  %p757_p8 = scmp.lt.u32.totalorder %s749_s25, %s1031_s29 }
 0x17f   : > { %p751_p10 = pnand %p750_p0, %p927_p12 }
 0x180   : > { %p756_p6 = por %p755_p4, %p754_p1 }
 0x181   : > { %p752_p2 = pneg %p751_p10 }
 0x182   : > { %p758_p13 = por %p757_p8, %p756_p6 }
 0x184   : > { %p759_p3 = pnand %p758_p13, %p752_p2 }
 0x186   : > { %762 = shalt.err (!%p759_p3)
}
 0x187   : > { %580 = dma.vmem_to_hbm [thread:$0]  (%p927_p12), %s1033_s7, 32, %s1031_s29, %s380_s20  }
 0x188 PF: > { %p601_p7 = scmp.ge.s32.totalorder %s809_s18, 2  ;;  %s418_s28 = sand.u32 1, %s797_s15  }
 0x189   : > { %p1093_p9 = scmp.ne.s32.totalorder %s1083_s22, 0  ;;  %s419_s10 = scalar_lea.sflag [#allocation4], %s418_s28 }
 0x18b   : > { %p592_p11 = pnand %p601_p7, %p1093_p9 }
 0x18d   : > { %788 = dma.done.wait (!%p592_p11), %s419_s10, 64  }
 0x18e   : > { %790 = vsyncadd (!%p592_p11), %s419_s10, 4294967232  ;;  %s428_s14 = scalar_lea.sflag [#allocation9], %s418_s28 }
 0x18f   : > { %792 = dma.done.wait (!%p592_p11), %s428_s14, 32  }
 0x190   : > { %794 = vsyncadd (!%p592_p11), %s428_s14, 4294967264  ;;  %p22_p12 = scmp.ge.s32.totalorder %s897_s27, 6   ;;  %s1094_s15 = smov %s801_s16 }
 0x191   : > { %s1095_s16 = smov %s805_s17  ;;  %s1096_s17 = smov %s923_s24 }
 0x192   : > { %s1097_s18 = smov %s897_s27  ;;  %24 = sbr.rel (!%p22_p12) target bundleno = 8 (0x8), region = 98 }
 0x199   :  { %433 = vsyncpa [#allocation3], 1 }
 0x19a   :  { %435 = vsyncpa [#allocation3 + $0x1], 1 }
 0x19b   :  { %436 = vsyncpa [#allocation6], 1 }
 0x19c   :  { %437 = vsyncpa [#allocation4], 1 }
 0x19d   :  { %439 = vsyncpa [#allocation4 + $0x1], 1 }
 0x19e   :  { %440 = vsyncpa [#allocation9], 1 }
 0x19f   :  { %442 = vsyncpa [#allocation9 + $0x1], 1 }

</bundles_post_ra>
